<compile_context>
chip_gen: v7x
topology: tpu7x:2x2x1
jax: 0.10.0
libtpu: 0.0.40
codegen_flags: <defaults>
</compile_context>

<pallas_src>
import functools

import jax
import jax.numpy as jnp
from jax.experimental import pallas as pl
from jax.experimental.pallas import tpu as pltpu

_LANE = 128  # lane width / MXU-friendly feature padding


def _round_up(x, m):
    return ((x + m - 1) // m) * m


def _mlp_kernel(x_ref, w1_ref, b1_ref, w2_ref, b2_ref, o_ref):
    # Fused Linear -> ReLU -> Linear on one batch tile; all operands in VMEM.
    x = x_ref[...]                                        # [TB, F_in_p] bf16
    h = jnp.dot(x, w1_ref[...],
                preferred_element_type=jnp.float32)       # [TB, H_p] f32 (MXU)
    h = h + b1_ref[...]                                   # f32 bias (VPU)
    h = jnp.maximum(h, 0.0)                               # f32 ReLU (VPU)
    y = jnp.dot(h.astype(jnp.bfloat16), w2_ref[...],
                preferred_element_type=jnp.float32)       # [TB, F_out_p] (MXU)
    y = y + b2_ref[...]                                   # f32 bias
    o_ref[...] = y.astype(o_ref.dtype)                    # lane-dense store


@functools.partial(jax.jit, static_argnames=("tb",))
def module_forward(x, w1, b1, w2, b2, *, tb=256):
    """Pallas equivalent of Module.forward(X) == self.net(X) for the MLP net.

    x : [B, F_in] float32
    w1: [F_in, H] float32 (PyTorch Linear weight, pre-transposed to [in, out])
    b1: [1, H]    float32
    w2: [H, F_out] float32
    b2: [1, F_out] float32
    returns [B, F_out] float32
    """
    B, F_in = x.shape
    H = w1.shape[1]
    F_out = w2.shape[1]

    # Lane-dense / MXU-friendly feature padding (zeros are exact).
    f_in_p = _round_up(F_in, _LANE)
    h_p = _round_up(H, _LANE)
    f_out_p = _round_up(F_out, _LANE)

    # Batch tile: multiple of 8 sublanes; pad B up to a multiple of TB so every
    # grid step runs on a full, unmasked tile (tail handled by padding).
    TB = tb if B >= tb else _round_up(B, 8)
    b_p = _round_up(B, TB)

    x_p = jnp.pad(x, ((0, b_p - B), (0, f_in_p - F_in))).astype(jnp.bfloat16)
    w1_p = jnp.pad(w1, ((0, f_in_p - F_in), (0, h_p - H))).astype(jnp.bfloat16)
    b1_p = jnp.pad(b1, ((0, 0), (0, h_p - H))).astype(jnp.float32)
    w2_p = jnp.pad(w2, ((0, h_p - H), (0, f_out_p - F_out))).astype(jnp.bfloat16)
    b2_p = jnp.pad(b2, ((0, 0), (0, f_out_p - F_out))).astype(jnp.float32)

    grid = (b_p // TB,)

    y_p = pl.pallas_call(
        _mlp_kernel,
        out_shape=jax.ShapeDtypeStruct((b_p, f_out_p), jnp.float32),
        grid_spec=pl.GridSpec(
            grid=grid,
            in_specs=[
                # Batch-tiled activations: new block each step (pipelined DMA).
                pl.BlockSpec((TB, f_in_p), lambda i: (i, 0)),
                # Weights/biases: same block every step -> VMEM resident.
                pl.BlockSpec((f_in_p, h_p), lambda i: (0, 0)),
                pl.BlockSpec((1, h_p), lambda i: (0, 0)),
                pl.BlockSpec((h_p, f_out_p), lambda i: (0, 0)),
                pl.BlockSpec((1, f_out_p), lambda i: (0, 0)),
            ],
            out_specs=pl.BlockSpec((TB, f_out_p), lambda i: (i, 0)),
        ),
        compiler_params=pltpu.CompilerParams(
            # Independent batch tiles: shard across TensorCores on v7x.
            dimension_semantics=("parallel",),
            vmem_limit_bytes=32 << 20,
        ),
    )(x_p, w1_p, b1_p, w2_p, b2_p)

    return y_p[:B, :F_out]


def _init_params(key, f_in, hidden, f_out):
    # Deterministic synthetic initialization (nn.Linear shapes, stored
    # pre-transposed as [in, out] for the kernel layout).
    k1, k2, k3, k4 = jax.random.split(key, 4)
    w1 = jax.random.normal(k1, (f_in, hidden), jnp.float32) * 0.1
    b1 = jax.random.normal(k2, (1, hidden), jnp.float32) * 0.01
    w2 = jax.random.normal(k3, (hidden, f_out), jnp.float32) * 0.1
    b2 = jax.random.normal(k4, (1, f_out), jnp.float32) * 0.01
    return w1, b1, w2, b2


def _ref_forward(x, w1, b1, w2, b2):
    return jnp.maximum(x @ w1 + b1, 0.0) @ w2 + b2


if __name__ == "__main__":
    key = jax.random.PRNGKey(0)
    kx1, kx2, kp = jax.random.split(key, 3)

    # Case 1: small shapes typical of the EEG/fNIRS head.
    B1, F_in, H, F_out = 32, 32, 32, 16
    w1, b1, w2, b2 = _init_params(kp, F_in, H, F_out)
    x1 = jax.random.normal(kx1, (B1, F_in), jnp.float32)
    y1 = jax.block_until_ready(module_forward(x1, w1, b1, w2, b2))
    ref1 = _ref_forward(x1, w1, b1, w2, b2)
    assert y1.shape == (B1, F_out)
    # bf16 MXU operands -> loosened tolerance vs. the f32 reference.
    assert jnp.allclose(y1, ref1, atol=3e-2, rtol=3e-2)

    # Case 2: batch not a multiple of the tile -> multi-step grid + padded tail.
    B2 = 300
    x2 = jax.random.normal(kx2, (B2, F_in), jnp.float32)
    y2 = jax.block_until_ready(module_forward(x2, w1, b1, w2, b2, tb=128))
    ref2 = _ref_forward(x2, w1, b1, w2, b2)
    assert y2.shape == (B2, F_out)
    assert jnp.allclose(y2, ref2, atol=3e-2, rtol=3e-2)

    print("KERNEL_OK")
</pallas_src>

<mosaic_0001>
module attributes {stable_mosaic.version = 11 : i64} {
  func.func @_mlp_kernel(%arg0: i32, %arg1: memref<32x128xbf16, #tpu.memory_space<vmem>>, %arg2: memref<128x128xbf16, #tpu.memory_space<vmem>>, %arg3: memref<1x128xf32, #tpu.memory_space<vmem>>, %arg4: memref<128x128xbf16, #tpu.memory_space<vmem>>, %arg5: memref<1x128xf32, #tpu.memory_space<vmem>>, %arg6: memref<32x128xf32, #tpu.memory_space<vmem>>) attributes {dimension_semantics = [#tpu.dimension_semantics<parallel>], iteration_bounds = array<i64: 1>, scalar_prefetch = 0 : i64, scratch_operands = 0 : i64, tpu.core_type = #tpu.core_type<tc>, window_params = [{transform_indices = @transform_0, window_bounds = array<i64: 32, 128>}, {pipeline_mode = #tpu.pipeline_mode<synchronous>, transform_indices = @transform_1, window_bounds = array<i64: 128, 128>}, {pipeline_mode = #tpu.pipeline_mode<synchronous>, transform_indices = @transform_2, window_bounds = array<i64: 1, 128>}, {pipeline_mode = #tpu.pipeline_mode<synchronous>, transform_indices = @transform_3, window_bounds = array<i64: 128, 128>}, {pipeline_mode = #tpu.pipeline_mode<synchronous>, transform_indices = @transform_4, window_bounds = array<i64: 1, 128>}, {transform_indices = @transform_5, window_bounds = array<i64: 32, 128>}]} {
    %c0 = arith.constant 0 : index
    %c0_0 = arith.constant 0 : index
    %0 = vector.load %arg1[%c0, %c0_0] : memref<32x128xbf16, #tpu.memory_space<vmem>>, vector<32x128xbf16>
    %c0_1 = arith.constant 0 : index
    %c0_2 = arith.constant 0 : index
    %1 = vector.load %arg2[%c0_1, %c0_2] : memref<128x128xbf16, #tpu.memory_space<vmem>>, vector<128x128xbf16>
    %cst = arith.constant dense<0.000000e+00> : vector<32x128xf32>
    %2 = tpu.matmul %0, %1, %cst {dimension_numbers = #tpu.dot_dimension_numbers<[1], [0], [0], [1], [0, 0, 1, 1], [], []>} : vector<32x128xbf16>, vector<128x128xbf16>, vector<32x128xf32> -> vector<32x128xf32>
    %c0_3 = arith.constant 0 : index
    %c0_4 = arith.constant 0 : index
    %3 = vector.load %arg3[%c0_3, %c0_4] : memref<1x128xf32, #tpu.memory_space<vmem>>, vector<1x128xf32>
    %4 = vector.broadcast %3 : vector<1x128xf32> to vector<32x128xf32>
    %5 = arith.addf %2, %4 : vector<32x128xf32>
    %cst_5 = arith.constant 0.000000e+00 : f32
    %6 = vector.broadcast %cst_5 : f32 to vector<32x128xf32>
    %7 = arith.maximumf %5, %6 : vector<32x128xf32>
    %8 = arith.truncf %7 : vector<32x128xf32> to vector<32x128xbf16>
    %c0_6 = arith.constant 0 : index
    %c0_7 = arith.constant 0 : index
    %9 = vector.load %arg4[%c0_6, %c0_7] : memref<128x128xbf16, #tpu.memory_space<vmem>>, vector<128x128xbf16>
    %cst_8 = arith.constant dense<0.000000e+00> : vector<32x128xf32>
    %10 = tpu.matmul %8, %9, %cst_8 {dimension_numbers = #tpu.dot_dimension_numbers<[1], [0], [0], [1], [0, 0, 1, 1], [], []>} : vector<32x128xbf16>, vector<128x128xbf16>, vector<32x128xf32> -> vector<32x128xf32>
    %c0_9 = arith.constant 0 : index
    %c0_10 = arith.constant 0 : index
    %11 = vector.load %arg5[%c0_9, %c0_10] : memref<1x128xf32, #tpu.memory_space<vmem>>, vector<1x128xf32>
    %12 = vector.broadcast %11 : vector<1x128xf32> to vector<32x128xf32>
    %13 = arith.addf %10, %12 : vector<32x128xf32>
    %c0_11 = arith.constant 0 : index
    %c0_12 = arith.constant 0 : index
    %14 = vector.load %arg6[%c0_11, %c0_12] : memref<32x128xf32, #tpu.memory_space<vmem>>, vector<32x128xf32>
    tpu.vector_store %arg6[%c0_11, %c0_12], %13 {strides = array<i32>} : memref<32x128xf32, #tpu.memory_space<vmem>>, vector<32x128xf32>,
    return
  }
  func.func @transform_0(%arg0: i32) -> (i32, i32) {
    %c0_i32 = arith.constant 0 : i32
    %c0_i32_0 = arith.constant 0 : i32
    return %arg0, %c0_i32 : i32, i32
  }
  func.func @transform_1(%arg0: i32) -> (i32, i32) {
    %c0_i32 = arith.constant 0 : i32
    %c0_i32_0 = arith.constant 0 : i32
    %c0_i32_1 = arith.constant 0 : i32
    return %c0_i32, %c0_i32_0 : i32, i32
  }
  func.func @transform_2(%arg0: i32) -> (i32, i32) {
    %c0_i32 = arith.constant 0 : i32
    %c0_i32_0 = arith.constant 0 : i32
    %c0_i32_1 = arith.constant 0 : i32
    return %c0_i32, %c0_i32_0 : i32, i32
  }
  func.func @transform_3(%arg0: i32) -> (i32, i32) {
    %c0_i32 = arith.constant 0 : i32
    %c0_i32_0 = arith.constant 0 : i32
    %c0_i32_1 = arith.constant 0 : i32
    return %c0_i32, %c0_i32_0 : i32, i32
  }
  func.func @transform_4(%arg0: i32) -> (i32, i32) {
    %c0_i32 = arith.constant 0 : i32
    %c0_i32_0 = arith.constant 0 : i32
    %c0_i32_1 = arith.constant 0 : i32
    return %c0_i32, %c0_i32_0 : i32, i32
  }
  func.func @transform_5(%arg0: i32) -> (i32, i32) {
    %c0_i32 = arith.constant 0 : i32
    %c0_i32_0 = arith.constant 0 : i32
    return %arg0, %c0_i32 : i32, i32
  }
}

</mosaic_0001>

<bundles_post_ra>
// kernel: module_forward.1
= control target key start
LH: loop header
LB: loop body
LE: loop exit
PB: predicated region body
PF: predicated region fallthrough
CT: control target
= control target key end

     0   :  { %s491_s1 = inlined_call_operand.vmem [shape: bf16[128,128], index: 1, kind: input, shape index: {}]   ;;  %s492_s0 = inlined_call_operand.vmem [shape: bf16[32,128], index: 0, kind: input, shape index: {}]   ;;  %s493_s3 = inlined_call_operand.vmem [shape: bf16[128,128], index: 3, kind: input, shape index: {}]   ;;  %s494_s2 = inlined_call_operand.vmem [shape: f32[1,128], index: 2, kind: input, shape index: {}]   ;;  %s495_s4 = inlined_call_operand.vmem [shape: f32[1,128], index: 4, kind: input, shape index: {}]   ;;  %s496_s5 = inlined_call_operand.vmem [shape: f32[32,128], index: 5, kind: output, shape index: {}]  }
   0x1   :  { %v371_v0 = vld [vmem:[%s491_s1] sm:$0xff]   ;;  %v372_v1 = vld [vmem:[%s491_s1 + $0x8] sm:$0xff]   ;;  %v373_v2 = vld [vmem:[%s491_s1 + $0x10] sm:$0xff]  }
   0x2   :  { %331 = vmatprep.subr.bf16.mxu0 %v371_v0  ;;  %v374_v3 = vld [vmem:[%s491_s1 + $0x18] sm:$0xff]   ;;  %v379_v4 = vld [vmem:[%s492_s0] sm:$0xff]   ;;  %v382_v6 = vld [vmem:[%s493_s3 + $0x8] sm:$0xff]  }
   0x3   :  { %332 = vmatpush3.bf16.msra.mxu0 %v371_v0  ;;  %347 = vmatprep.mubr.bf16.mxu0 %v379_v4  ;;  %v381_v5 = vld [vmem:[%s493_s3] sm:$0xff]   ;;  %v383_v8 = vld [vmem:[%s493_s3 + $0x10] sm:$0xff]   ;;  %v376_v9 = vld [vmem:[%s491_s1 + $0x28] sm:$0xff]  }
   0x4   :  { %333 = vmatprep.subr.bf16.mxu0 %v372_v1  ;;  %v375_v7 = vld [vmem:[%s491_s1 + $0x20] sm:$0xff]   ;;  %351 = vmatprep.subr.bf16.mxu1 %v381_v5  ;;  %v384_v10 = vld [vmem:[%s493_s3 + $0x18] sm:$0xff]   ;;  %v377_v11 = vld [vmem:[%s491_s1 + $0x30] sm:$0xff]  }
   0x5   :  { %352 = vmatpush3.bf16.msra.mxu1 %v381_v5  ;;  %v385_v12 = vld [vmem:[%s493_s3 + $0x20] sm:$0xff]   ;;  %v378_v13 = vld [vmem:[%s491_s1 + $0x38] sm:$0xff]   ;;  %v386_v14 = vld [vmem:[%s493_s3 + $0x28] sm:$0xff]  }
   0x6   :  { %353 = vmatprep.subr.bf16.mxu1 %v382_v6  ;;  %v380_v15 = vld [vmem:[%s492_s0 + $0x8] sm:$0xff]   ;;  %v387_v16 = vld [vmem:[%s493_s3 + $0x30] sm:$0xff]   ;;  %v388_v17 = vld [vmem:[%s493_s3 + $0x38] sm:$0xff]  }
   0x7   :  { %334 = vmatpush3.bf16.msra.mxu0 %v372_v1  ;;  %v291_v18 = vld [vmem:[%s494_s2] ss:$0 sm:$0xff] }
   0x8   :  { %335 = vmatprep.subr.bf16.mxu0 %v373_v2  ;;  %v302_v33 = vld [vmem:[%s495_s4] ss:$0 sm:$0xff] }
   0x9   :  { %354 = vmatpush3.bf16.msra.mxu1 %v382_v6 }
   0xa   :  { %355 = vmatprep.subr.bf16.mxu1 %v383_v8 }
   0xb   :  { %336 = vmatpush3.bf16.msra.mxu0 %v373_v2 }
   0xc   :  { %337 = vmatprep.subr.bf16.mxu0 %v374_v3 }
   0xd   :  { %356 = vmatpush3.bf16.msra.mxu1 %v383_v8 }
   0xe   :  { %357 = vmatprep.subr.bf16.mxu1 %v384_v10 }
   0xf   :  { %338 = vmatpush3.bf16.msra.mxu0 %v374_v3 }
  0x10   :  { %339 = vmatprep.subr.bf16.mxu0 %v375_v7 }
  0x11   :  { %358 = vmatpush3.bf16.msra.mxu1 %v384_v10 }
  0x12   :  { %359 = vmatprep.subr.bf16.mxu1 %v385_v12 }
  0x13   :  { %340 = vmatpush3.bf16.msra.mxu0 %v375_v7 }
  0x14   :  { %341 = vmatprep.subr.bf16.mxu0 %v376_v9 }
  0x15   :  { %360 = vmatpush3.bf16.msra.mxu1 %v385_v12 }
  0x16   :  { %361 = vmatprep.subr.bf16.mxu1 %v386_v14 }
  0x17   :  { %342 = vmatpush3.bf16.msra.mxu0 %v376_v9 }
  0x18   :  { %343 = vmatprep.subr.bf16.mxu0 %v377_v11 }
  0x19   :  { %362 = vmatpush3.bf16.msra.mxu1 %v386_v14 }
  0x1a   :  { %363 = vmatprep.subr.bf16.mxu1 %v387_v16 }
  0x1b   :  { %344 = vmatpush3.bf16.msra.mxu0 %v377_v11 }
  0x1c   :  { %345 = vmatprep.subr.bf16.mxu0 %v378_v13 }
  0x1d   :  { %364 = vmatpush3.bf16.msra.mxu1 %v387_v16 }
  0x1e   :  { %365 = vmatprep.subr.bf16.mxu1 %v388_v17 }
  0x1f   :  { %346 = vmatpush3.bf16.msra.mxu0 %v378_v13 }
  0x21   :  { %366 = vmatpush3.bf16.msra.mxu1 %v388_v17 }
  0x22   :  { %348 = vmatmul.mubr.bf16.vlgmr.msra.gmra.mrb[0].mxu0 %v380_v15 }
  0xf5   :  { %v349_v19 = vpop.f32.mrb[0].mxu0 }
  0xf6   :  { %v151_v20 = vadd.f32 %v349_v19, %v291_v18  ;;  %v142_v21 = vpop.f32.mrb[1].mxu0 }
  0xf7   :  { %v143_v22 = vadd.f32 %v291_v18, %v142_v21  ;;  %v350_v23 = vpop.f32.mrb[2].mxu0 }
  0xf8   :  { %v154_v24 = vadd.f32 %v350_v23, %v291_v18  ;;  %v145_v25 = vpop.f32.mrb[3].mxu0  ;;  %v159_v27 = vmax.f32 %v151_v20, 0.0 }
  0xf9   :  { %v146_v26 = vadd.f32 %v291_v18, %v145_v25  ;;  %v157_v29 = vmax.f32 %v143_v22, 0.0 }
  0xfa   :  { %v160_v28 = vmax.f32 %v154_v24, 0.0 }
  0xfb   :  { %v158_v30 = vmax.f32 %v146_v26, 0.0 }
  0xfc   :  { %v162_v31 = vpack.c.bf16 %v160_v28, %v159_v27 }
  0xfd   :  { %v161_v32 = vpack.c.bf16 %v158_v30, %v157_v29 }
  0xff   :  { %367 = vmatprep.mubr.bf16.mxu1 %v161_v32 }
 0x100   :  { %368 = vmatmul.mubr.bf16.vlgmr.msra.gmra.mrb[0].mxu1 %v162_v31 }
 0x1d3   :  { %v369_v34 = vpop.f32.mrb[0].mxu1 }
 0x1d4   :  { %v277_v35 = vadd.f32 %v369_v34, %v302_v33  ;;  %v268_v36 = vpop.f32.mrb[1].mxu1 }
 0x1d5   :  { %v269_v37 = vadd.f32 %v302_v33, %v268_v36  ;;  %v370_v38 = vpop.f32.mrb[2].mxu1 }
 0x1d6   :  { %285 = vst [vmem:[%s496_s5 + $0x10] sm:$0xff] %v277_v35  ;;  %v280_v39 = vadd.f32 %v370_v38, %v302_v33  ;;  %v271_v40 = vpop.f32.mrb[3].mxu1 }
 0x1d7   :  { %283 = vst [vmem:[%s496_s5] sm:$0xff] %v269_v37  ;;  %v272_v41 = vadd.f32 %v302_v33, %v271_v40 }
 0x1d8   :  { %286 = vst [vmem:[%s496_s5 + $0x18] sm:$0xff] %v280_v39 }
 0x1d9   :  { %284 = vst [vmem:[%s496_s5 + $0x8] sm:$0xff] %v272_v41 }

</bundles_post_ra>
